<compile_context>
chip_gen: v6e
topology: v6e:2x2x1
jax: 0.10.0
libtpu: 0.0.40
codegen_flags: <defaults>
</compile_context>

<pallas_src>
import functools

import numpy as np
import jax
import jax.numpy as jnp
from jax.experimental import pallas as pl
from jax.experimental.pallas import tpu as pltpu


# ---------------------------------------------------------------------------
# helpers
# ---------------------------------------------------------------------------
def _round_up(x, m):
    return (x + m - 1) // m * m


def _pad2(a, rows, cols):
    return jnp.pad(a, ((0, rows - a.shape[0]), (0, cols - a.shape[1])))


def _pick_tiles(n_pad):
    """Pick (tm, tk) node tiles that divide n_pad (n_pad is a multiple of 128)."""
    def pick():
        for c in (512, 256, 128):
            if n_pad % c == 0:
                return c
        return 128
    tm = pick()
    tk = pick()
    # Keep >= 2 row tiles when possible so the "parallel" axis can be split
    # across the two TensorCores on v7x.
    if tm == n_pad and n_pad >= 256:
        tm = n_pad // 2
    return tm, tk


# ---------------------------------------------------------------------------
# feature transform kernel:  out = relu?(x @ W + b)   (row-tiled)
# ---------------------------------------------------------------------------
def _transform_kernel(x_ref, w_ref, b_ref, o_ref, *, apply_relu):
    xw = jnp.dot(x_ref[...], w_ref[...], preferred_element_type=jnp.float32)
    out = xw + b_ref[...]                      # (1, F_out) broadcasts over rows
    if apply_relu:
        out = jnp.maximum(out, 0.0)
    o_ref[...] = out.astype(o_ref.dtype)


def _transform(x, w, b, *, apply_relu, out_dtype, tm):
    n_pad, f_in_p = x.shape
    f_out_p = w.shape[1]
    kernel = functools.partial(_transform_kernel, apply_relu=apply_relu)
    out_bytes = n_pad * f_out_p * np.dtype(out_dtype).itemsize
    return pl.pallas_call(
        kernel,
        out_shape=jax.ShapeDtypeStruct((n_pad, f_out_p), out_dtype),
        grid=(n_pad // tm,),
        in_specs=[
            pl.BlockSpec((tm, f_in_p), lambda i: (i, 0)),
            pl.BlockSpec((f_in_p, f_out_p), lambda i: (0, 0)),   # W resident
            pl.BlockSpec((1, f_out_p), lambda i: (0, 0)),        # bias resident
        ],
        out_specs=pl.BlockSpec((tm, f_out_p), lambda i: (i, 0)),
        compiler_params=pltpu.CompilerParams(
            dimension_semantics=("parallel",)),
        cost_estimate=pl.CostEstimate(
            flops=2 * n_pad * f_in_p * f_out_p,
            transcendentals=0,
            bytes_accessed=int(x.size * x.dtype.itemsize
                               + w.size * w.dtype.itemsize
                               + out_bytes)),
    )(x, w, b)


# ---------------------------------------------------------------------------
# aggregation kernel:  out = relu?(A_hat @ m + b)   (tiled over rows x contraction)
# ---------------------------------------------------------------------------
def _aggregate_kernel(adj_ref, m_ref, b_ref, o_ref, acc_ref, *, apply_relu):
    k = pl.program_id(1)

    @pl.when(k == 0)
    def _():
        acc_ref[...] = jnp.zeros_like(acc_ref)

    acc_ref[...] += jnp.dot(adj_ref[...], m_ref[...],
                            preferred_element_type=jnp.float32)

    @pl.when(k == pl.num_programs(1) - 1)
    def _():
        out = acc_ref[...] + b_ref[...]
        if apply_relu:
            out = jnp.maximum(out, 0.0)
        o_ref[...] = out.astype(o_ref.dtype)


def _aggregate(adj, m, b, *, apply_relu, out_dtype, tm, tk):
    n_pad = adj.shape[0]
    f_p = m.shape[1]
    kernel = functools.partial(_aggregate_kernel, apply_relu=apply_relu)
    out_bytes = n_pad * f_p * np.dtype(out_dtype).itemsize
    return pl.pallas_call(
        kernel,
        out_shape=jax.ShapeDtypeStruct((n_pad, f_p), out_dtype),
        grid=(n_pad // tm, n_pad // tk),
        in_specs=[
            pl.BlockSpec((tm, tk), lambda i, k: (i, k)),       # adjacency tile
            pl.BlockSpec((tk, f_p), lambda i, k: (k, 0)),      # feature tile
            pl.BlockSpec((1, f_p), lambda i, k: (0, 0)),       # bias (resident)
        ],
        out_specs=pl.BlockSpec((tm, f_p), lambda i, k: (i, 0)),
        scratch_shapes=[pltpu.VMEM((tm, f_p), jnp.float32)],
        compiler_params=pltpu.CompilerParams(
            dimension_semantics=("parallel", "arbitrary")),
        cost_estimate=pl.CostEstimate(
            flops=2 * n_pad * n_pad * f_p,
            transcendentals=0,
            bytes_accessed=int(adj.size * adj.dtype.itemsize
                               + (n_pad // tm) * m.size * m.dtype.itemsize
                               + out_bytes)),
    )(adj, m, b)


# ---------------------------------------------------------------------------
# one GCNConv layer
# ---------------------------------------------------------------------------
def gcn_layer(adj, x, w, b, f_in, f_out, *, apply_relu, out_dtype):
    """relu?(A_hat @ (x @ W) + b) with association chosen so the narrower
    feature width rides the N^2 contraction."""
    n_pad = adj.shape[0]
    tm, tk = _pick_tiles(n_pad)
    if f_in <= f_out:
        # (A @ x) @ W + b : aggregate on the narrower F_in features first.
        zero_b = jnp.zeros((1, x.shape[1]), jnp.float32)
        ax = _aggregate(adj, x, zero_b, apply_relu=False,
                        out_dtype=jnp.bfloat16, tm=tm, tk=tk)
        return _transform(ax, w, b, apply_relu=apply_relu,
                          out_dtype=out_dtype, tm=tm)
    else:
        # A @ (x @ W) + b : transform down to the narrower F_out first.
        zero_b = jnp.zeros((1, w.shape[1]), jnp.float32)
        xw = _transform(x, w, zero_b, apply_relu=False,
                        out_dtype=jnp.bfloat16, tm=tm)
        return _aggregate(adj, xw, b, apply_relu=apply_relu,
                          out_dtype=out_dtype, tm=tm, tk=tk)


# ---------------------------------------------------------------------------
# adjacency normalization (plain JAX glue) + full forward
# ---------------------------------------------------------------------------
def gcn_norm_dense(edge_index, num_nodes):
    """Dense D^{-1/2}(A+I)D^{-1/2} from [2, E] edge_index (src row 0, dst row 1)."""
    src = edge_index[0]
    dst = edge_index[1]
    a = jnp.zeros((num_nodes, num_nodes), jnp.float32).at[dst, src].set(1.0)
    a = jnp.maximum(a, jnp.eye(num_nodes, dtype=jnp.float32))  # self loops
    deg = a.sum(axis=1)
    dinv_sqrt = jnp.where(deg > 0.0, 1.0 / jnp.sqrt(deg), 0.0)
    return a * dinv_sqrt[:, None] * dinv_sqrt[None, :]


def gcn_forward(x, edge_index, params):
    """h = relu(GCNConv1(x, ei)); logits = GCNConv2(h, ei)."""
    n, f_in = x.shape
    hid = params["w1"].shape[1]
    out = params["w2"].shape[1]

    n_pad = _round_up(n, 128)
    f_in_p = _round_up(f_in, 128)
    hid_p = _round_up(hid, 128)
    out_p = _round_up(out, 128)

    adj = gcn_norm_dense(edge_index, n)
    adj_p = _pad2(adj, n_pad, n_pad).astype(jnp.bfloat16)
    x_p = _pad2(x, n_pad, f_in_p).astype(jnp.bfloat16)
    w1_p = _pad2(params["w1"], f_in_p, hid_p).astype(jnp.bfloat16)
    w2_p = _pad2(params["w2"], hid_p, out_p).astype(jnp.bfloat16)
    b1_p = jnp.pad(params["b1"], (0, hid_p - hid)).reshape(1, hid_p).astype(jnp.float32)
    b2_p = jnp.pad(params["b2"], (0, out_p - out)).reshape(1, out_p).astype(jnp.float32)

    h = gcn_layer(adj_p, x_p, w1_p, b1_p, f_in, hid,
                  apply_relu=True, out_dtype=jnp.bfloat16)
    logits_p = gcn_layer(adj_p, h, w2_p, b2_p, hid, out,
                         apply_relu=False, out_dtype=jnp.float32)
    return logits_p[:n, :out]


def _glorot(key, shape):
    fan_in, fan_out = shape
    limit = jnp.sqrt(6.0 / (fan_in + fan_out))
    return jax.random.uniform(key, shape, jnp.float32, -limit, limit)


if __name__ == "__main__":
    num_nodes, feature_dim, hidden_dim, out_dim = 16, 16, 32, 8
    num_edges = 32

    key = jax.random.PRNGKey(0)
    kx, ksrc, kdst, kw1, kw2 = jax.random.split(key, 5)

    x = jax.random.normal(kx, (num_nodes, feature_dim), jnp.float32)
    src = jax.random.randint(ksrc, (num_edges,), 0, num_nodes, jnp.int32)
    dst = jax.random.randint(kdst, (num_edges,), 0, num_nodes, jnp.int32)
    edge_index = jnp.stack([src, dst], axis=0)  # [2, E]

    params = {
        "w1": _glorot(kw1, (feature_dim, hidden_dim)),
        "b1": jnp.zeros((hidden_dim,), jnp.float32),
        "w2": _glorot(kw2, (hidden_dim, out_dim)),
        "b2": jnp.zeros((out_dim,), jnp.float32),
    }

    logits = jax.jit(gcn_forward)(x, edge_index, params)
    jax.block_until_ready(logits)
    assert logits.shape == (num_nodes, out_dim)
    print("KERNEL_OK")
</pallas_src>

<mosaic_0001>
module attributes {stable_mosaic.version = 11 : i64} {
  func.func @_aggregate_kernel(%arg0: i32, %arg1: i32, %arg2: memref<128x128xbf16, #tpu.memory_space<vmem>>, %arg3: memref<128x128xbf16, #tpu.memory_space<vmem>>, %arg4: memref<1x128xf32, #tpu.memory_space<vmem>>, %arg5: memref<128x128xbf16, #tpu.memory_space<vmem>>, %arg6: memref<128x128xf32, #tpu.memory_space<vmem>>) attributes {dimension_semantics = [#tpu.dimension_semantics<parallel>, #tpu.dimension_semantics<arbitrary>], iteration_bounds = array<i64: 1, 1>, scalar_prefetch = 0 : i64, scratch_operands = 1 : i64, tpu.core_type = #tpu.core_type<tc>, window_params = [{transform_indices = @transform_0, window_bounds = array<i64: 128, 128>}, {transform_indices = @transform_1, window_bounds = array<i64: 128, 128>}, {pipeline_mode = #tpu.pipeline_mode<synchronous>, transform_indices = @transform_2, window_bounds = array<i64: 1, 128>}, {transform_indices = @transform_3, window_bounds = array<i64: 128, 128>}]} {
    %c0_i32 = arith.constant 0 : i32
    %0 = arith.cmpi eq, %arg1, %c0_i32 : i32
    %1 = arith.extui %0 : i1 to i32
    %c0_i32_0 = arith.constant 0 : i32
    %2 = arith.cmpi ne, %1, %c0_i32_0 : i32
    scf.if %2 {
      %cst_10 = arith.constant 0.000000e+00 : f32
      %12 = vector.broadcast %cst_10 : f32 to vector<128x128xf32>
      %c0_11 = arith.constant 0 : index
      %c0_12 = arith.constant 0 : index
      %13 = vector.load %arg6[%c0_11, %c0_12] : memref<128x128xf32, #tpu.memory_space<vmem>>, vector<128x128xf32>
      tpu.vector_store %arg6[%c0_11, %c0_12], %12 {strides = array<i32>} : memref<128x128xf32, #tpu.memory_space<vmem>>, vector<128x128xf32>,
    } else {
    }
    %c0 = arith.constant 0 : index
    %c0_1 = arith.constant 0 : index
    %3 = vector.load %arg6[%c0, %c0_1] : memref<128x128xf32, #tpu.memory_space<vmem>>, vector<128x128xf32>
    %c0_2 = arith.constant 0 : index
    %c0_3 = arith.constant 0 : index
    %4 = vector.load %arg2[%c0_2, %c0_3] : memref<128x128xbf16, #tpu.memory_space<vmem>>, vector<128x128xbf16>
    %c0_4 = arith.constant 0 : index
    %c0_5 = arith.constant 0 : index
    %5 = vector.load %arg3[%c0_4, %c0_5] : memref<128x128xbf16, #tpu.memory_space<vmem>>, vector<128x128xbf16>
    %cst = arith.constant dense<0.000000e+00> : vector<128x128xf32>
    %6 = tpu.matmul %4, %5, %cst {dimension_numbers = #tpu.dot_dimension_numbers<[1], [0], [0], [1], [0, 0, 1, 1], [], []>} : vector<128x128xbf16>, vector<128x128xbf16>, vector<128x128xf32> -> vector<128x128xf32>
    %7 = arith.addf %3, %6 : vector<128x128xf32>
    %c0_6 = arith.constant 0 : index
    %c0_7 = arith.constant 0 : index
    %8 = vector.load %arg6[%c0_6, %c0_7] : memref<128x128xf32, #tpu.memory_space<vmem>>, vector<128x128xf32>
    tpu.vector_store %arg6[%c0_6, %c0_7], %7 {strides = array<i32>} : memref<128x128xf32, #tpu.memory_space<vmem>>, vector<128x128xf32>,
    %c0_i32_8 = arith.constant 0 : i32
    %9 = arith.cmpi eq, %arg1, %c0_i32_8 : i32
    %10 = arith.extui %9 : i1 to i32
    %c0_i32_9 = arith.constant 0 : i32
    %11 = arith.cmpi ne, %10, %c0_i32_9 : i32
    scf.if %11 {
      %c0_10 = arith.constant 0 : index
      %c0_11 = arith.constant 0 : index
      %12 = vector.load %arg6[%c0_10, %c0_11] : memref<128x128xf32, #tpu.memory_space<vmem>>, vector<128x128xf32>
      %c0_12 = arith.constant 0 : index
      %c0_13 = arith.constant 0 : index
      %13 = vector.load %arg4[%c0_12, %c0_13] : memref<1x128xf32, #tpu.memory_space<vmem>>, vector<1x128xf32>
      %14 = vector.broadcast %13 : vector<1x128xf32> to vector<128x128xf32>
      %15 = arith.addf %12, %14 : vector<128x128xf32>
      %16 = arith.truncf %15 : vector<128x128xf32> to vector<128x128xbf16>
      %c0_14 = arith.constant 0 : index
      %c0_15 = arith.constant 0 : index
      %17 = vector.load %arg5[%c0_14, %c0_15] : memref<128x128xbf16, #tpu.memory_space<vmem>>, vector<128x128xbf16>
      tpu.vector_store %arg5[%c0_14, %c0_15], %16 {strides = array<i32>} : memref<128x128xbf16, #tpu.memory_space<vmem>>, vector<128x128xbf16>,
    } else {
    }
    return
  }
  func.func @transform_0(%arg0: i32, %arg1: i32) -> (i32, i32) {
    %c0_i32 = arith.constant 0 : i32
    return %arg0, %arg1 : i32, i32
  }
  func.func @transform_1(%arg0: i32, %arg1: i32) -> (i32, i32) {
    %c0_i32 = arith.constant 0 : i32
    %c0_i32_0 = arith.constant 0 : i32
    return %arg1, %c0_i32 : i32, i32
  }
  func.func @transform_2(%arg0: i32, %arg1: i32) -> (i32, i32) {
    %c0_i32 = arith.constant 0 : i32
    %c0_i32_0 = arith.constant 0 : i32
    %c0_i32_1 = arith.constant 0 : i32
    return %c0_i32, %c0_i32_0 : i32, i32
  }
  func.func @transform_3(%arg0: i32, %arg1: i32) -> (i32, i32) {
    %c0_i32 = arith.constant 0 : i32
    %c0_i32_0 = arith.constant 0 : i32
    return %arg0, %c0_i32 : i32, i32
  }
}

module attributes {stable_mosaic.version = 11 : i64} {
  func.func @_transform_kernel(%arg0: i32, %arg1: memref<128x128xbf16, #tpu.memory_space<vmem>>, %arg2: memref<128x128xbf16, #tpu.memory_space<vmem>>, %arg3: memref<1x128xf32, #tpu.memory_space<vmem>>, %arg4: memref<128x128xbf16, #tpu.memory_space<vmem>>) attributes {dimension_semantics = [#tpu.dimension_semantics<parallel>], iteration_bounds = array<i64: 1>, scalar_prefetch = 0 : i64, scratch_operands = 0 : i64, tpu.core_type = #tpu.core_type<tc>, window_params = [{transform_indices = @transform_0, window_bounds = array<i64: 128, 128>}, {pipeline_mode = #tpu.pipeline_mode<synchronous>, transform_indices = @transform_1, window_bounds = array<i64: 128, 128>}, {pipeline_mode = #tpu.pipeline_mode<synchronous>, transform_indices = @transform_2, window_bounds = array<i64: 1, 128>}, {transform_indices = @transform_3, window_bounds = array<i64: 128, 128>}]} {
    %c0 = arith.constant 0 : index
    %c0_0 = arith.constant 0 : index
    %0 = vector.load %arg1[%c0, %c0_0] : memref<128x128xbf16, #tpu.memory_space<vmem>>, vector<128x128xbf16>
    %c0_1 = arith.constant 0 : index
    %c0_2 = arith.constant 0 : index
    %1 = vector.load %arg2[%c0_1, %c0_2] : memref<128x128xbf16, #tpu.memory_space<vmem>>, vector<128x128xbf16>
    %cst = arith.constant dense<0.000000e+00> : vector<128x128xf32>
    %2 = tpu.matmul %0, %1, %cst {dimension_numbers = #tpu.dot_dimension_numbers<[1], [0], [0], [1], [0, 0, 1, 1], [], []>} : vector<128x128xbf16>, vector<128x128xbf16>, vector<128x128xf32> -> vector<128x128xf32>
    %c0_3 = arith.constant 0 : index
    %c0_4 = arith.constant 0 : index
    %3 = vector.load %arg3[%c0_3, %c0_4] : memref<1x128xf32, #tpu.memory_space<vmem>>, vector<1x128xf32>
    %4 = vector.broadcast %3 : vector<1x128xf32> to vector<128x128xf32>
    %5 = arith.addf %2, %4 : vector<128x128xf32>
    %cst_5 = arith.constant 0.000000e+00 : f32
    %6 = vector.broadcast %cst_5 : f32 to vector<128x128xf32>
    %7 = arith.maximumf %5, %6 : vector<128x128xf32>
    %8 = arith.truncf %7 : vector<128x128xf32> to vector<128x128xbf16>
    %c0_6 = arith.constant 0 : index
    %c0_7 = arith.constant 0 : index
    %9 = vector.load %arg4[%c0_6, %c0_7] : memref<128x128xbf16, #tpu.memory_space<vmem>>, vector<128x128xbf16>
    tpu.vector_store %arg4[%c0_6, %c0_7], %8 {strides = array<i32>} : memref<128x128xbf16, #tpu.memory_space<vmem>>, vector<128x128xbf16>,
    return
  }
  func.func @transform_0(%arg0: i32) -> (i32, i32) {
    %c0_i32 = arith.constant 0 : i32
    %c0_i32_0 = arith.constant 0 : i32
    return %arg0, %c0_i32 : i32, i32
  }
  func.func @transform_1(%arg0: i32) -> (i32, i32) {
    %c0_i32 = arith.constant 0 : i32
    %c0_i32_0 = arith.constant 0 : i32
    %c0_i32_1 = arith.constant 0 : i32
    return %c0_i32, %c0_i32_0 : i32, i32
  }
  func.func @transform_2(%arg0: i32) -> (i32, i32) {
    %c0_i32 = arith.constant 0 : i32
    %c0_i32_0 = arith.constant 0 : i32
    %c0_i32_1 = arith.constant 0 : i32
    return %c0_i32, %c0_i32_0 : i32, i32
  }
  func.func @transform_3(%arg0: i32) -> (i32, i32) {
    %c0_i32 = arith.constant 0 : i32
    %c0_i32_0 = arith.constant 0 : i32
    return %arg0, %c0_i32 : i32, i32
  }
}

module attributes {stable_mosaic.version = 11 : i64} {
  func.func @_transform_kernel(%arg0: i32, %arg1: memref<128x128xbf16, #tpu.memory_space<vmem>>, %arg2: memref<128x128xbf16, #tpu.memory_space<vmem>>, %arg3: memref<1x128xf32, #tpu.memory_space<vmem>>, %arg4: memref<128x128xbf16, #tpu.memory_space<vmem>>) attributes {dimension_semantics = [#tpu.dimension_semantics<parallel>], iteration_bounds = array<i64: 1>, scalar_prefetch = 0 : i64, scratch_operands = 0 : i64, tpu.core_type = #tpu.core_type<tc>, window_params = [{transform_indices = @transform_0, window_bounds = array<i64: 128, 128>}, {pipeline_mode = #tpu.pipeline_mode<synchronous>, transform_indices = @transform_1, window_bounds = array<i64: 128, 128>}, {pipeline_mode = #tpu.pipeline_mode<synchronous>, transform_indices = @transform_2, window_bounds = array<i64: 1, 128>}, {transform_indices = @transform_3, window_bounds = array<i64: 128, 128>}]} {
    %c0 = arith.constant 0 : index
    %c0_0 = arith.constant 0 : index
    %0 = vector.load %arg1[%c0, %c0_0] : memref<128x128xbf16, #tpu.memory_space<vmem>>, vector<128x128xbf16>
    %c0_1 = arith.constant 0 : index
    %c0_2 = arith.constant 0 : index
    %1 = vector.load %arg2[%c0_1, %c0_2] : memref<128x128xbf16, #tpu.memory_space<vmem>>, vector<128x128xbf16>
    %cst = arith.constant dense<0.000000e+00> : vector<128x128xf32>
    %2 = tpu.matmul %0, %1, %cst {dimension_numbers = #tpu.dot_dimension_numbers<[1], [0], [0], [1], [0, 0, 1, 1], [], []>} : vector<128x128xbf16>, vector<128x128xbf16>, vector<128x128xf32> -> vector<128x128xf32>
    %c0_3 = arith.constant 0 : index
    %c0_4 = arith.constant 0 : index
    %3 = vector.load %arg3[%c0_3, %c0_4] : memref<1x128xf32, #tpu.memory_space<vmem>>, vector<1x128xf32>
    %4 = vector.broadcast %3 : vector<1x128xf32> to vector<128x128xf32>
    %5 = arith.addf %2, %4 : vector<128x128xf32>
    %6 = arith.truncf %5 : vector<128x128xf32> to vector<128x128xbf16>
    %c0_5 = arith.constant 0 : index
    %c0_6 = arith.constant 0 : index
    %7 = vector.load %arg4[%c0_5, %c0_6] : memref<128x128xbf16, #tpu.memory_space<vmem>>, vector<128x128xbf16>
    tpu.vector_store %arg4[%c0_5, %c0_6], %6 {strides = array<i32>} : memref<128x128xbf16, #tpu.memory_space<vmem>>, vector<128x128xbf16>,
    return
  }
  func.func @transform_0(%arg0: i32) -> (i32, i32) {
    %c0_i32 = arith.constant 0 : i32
    %c0_i32_0 = arith.constant 0 : i32
    return %arg0, %c0_i32 : i32, i32
  }
  func.func @transform_1(%arg0: i32) -> (i32, i32) {
    %c0_i32 = arith.constant 0 : i32
    %c0_i32_0 = arith.constant 0 : i32
    %c0_i32_1 = arith.constant 0 : i32
    return %c0_i32, %c0_i32_0 : i32, i32
  }
  func.func @transform_2(%arg0: i32) -> (i32, i32) {
    %c0_i32 = arith.constant 0 : i32
    %c0_i32_0 = arith.constant 0 : i32
    %c0_i32_1 = arith.constant 0 : i32
    return %c0_i32, %c0_i32_0 : i32, i32
  }
  func.func @transform_3(%arg0: i32) -> (i32, i32) {
    %c0_i32 = arith.constant 0 : i32
    %c0_i32_0 = arith.constant 0 : i32
    return %arg0, %c0_i32 : i32, i32
  }
}

module attributes {stable_mosaic.version = 11 : i64} {
  func.func @_aggregate_kernel(%arg0: i32, %arg1: i32, %arg2: memref<128x128xbf16, #tpu.memory_space<vmem>>, %arg3: memref<128x128xbf16, #tpu.memory_space<vmem>>, %arg4: memref<1x128xf32, #tpu.memory_space<vmem>>, %arg5: memref<128x128xf32, #tpu.memory_space<vmem>>, %arg6: memref<128x128xf32, #tpu.memory_space<vmem>>) attributes {dimension_semantics = [#tpu.dimension_semantics<parallel>, #tpu.dimension_semantics<arbitrary>], iteration_bounds = array<i64: 1, 1>, scalar_prefetch = 0 : i64, scratch_operands = 1 : i64, tpu.core_type = #tpu.core_type<tc>, window_params = [{transform_indices = @transform_0, window_bounds = array<i64: 128, 128>}, {transform_indices = @transform_1, window_bounds = array<i64: 128, 128>}, {pipeline_mode = #tpu.pipeline_mode<synchronous>, transform_indices = @transform_2, window_bounds = array<i64: 1, 128>}, {transform_indices = @transform_3, window_bounds = array<i64: 128, 128>}]} {
    %c0_i32 = arith.constant 0 : i32
    %0 = arith.cmpi eq, %arg1, %c0_i32 : i32
    %1 = arith.extui %0 : i1 to i32
    %c0_i32_0 = arith.constant 0 : i32
    %2 = arith.cmpi ne, %1, %c0_i32_0 : i32
    scf.if %2 {
      %cst_10 = arith.constant 0.000000e+00 : f32
      %12 = vector.broadcast %cst_10 : f32 to vector<128x128xf32>
      %c0_11 = arith.constant 0 : index
      %c0_12 = arith.constant 0 : index
      %13 = vector.load %arg6[%c0_11, %c0_12] : memref<128x128xf32, #tpu.memory_space<vmem>>, vector<128x128xf32>
      tpu.vector_store %arg6[%c0_11, %c0_12], %12 {strides = array<i32>} : memref<128x128xf32, #tpu.memory_space<vmem>>, vector<128x128xf32>,
    } else {
    }
    %c0 = arith.constant 0 : index
    %c0_1 = arith.constant 0 : index
    %3 = vector.load %arg6[%c0, %c0_1] : memref<128x128xf32, #tpu.memory_space<vmem>>, vector<128x128xf32>
    %c0_2 = arith.constant 0 : index
    %c0_3 = arith.constant 0 : index
    %4 = vector.load %arg2[%c0_2, %c0_3] : memref<128x128xbf16, #tpu.memory_space<vmem>>, vector<128x128xbf16>
    %c0_4 = arith.constant 0 : index
    %c0_5 = arith.constant 0 : index
    %5 = vector.load %arg3[%c0_4, %c0_5] : memref<128x128xbf16, #tpu.memory_space<vmem>>, vector<128x128xbf16>
    %cst = arith.constant dense<0.000000e+00> : vector<128x128xf32>
    %6 = tpu.matmul %4, %5, %cst {dimension_numbers = #tpu.dot_dimension_numbers<[1], [0], [0], [1], [0, 0, 1, 1], [], []>} : vector<128x128xbf16>, vector<128x128xbf16>, vector<128x128xf32> -> vector<128x128xf32>
    %7 = arith.addf %3, %6 : vector<128x128xf32>
    %c0_6 = arith.constant 0 : index
    %c0_7 = arith.constant 0 : index
    %8 = vector.load %arg6[%c0_6, %c0_7] : memref<128x128xf32, #tpu.memory_space<vmem>>, vector<128x128xf32>
    tpu.vector_store %arg6[%c0_6, %c0_7], %7 {strides = array<i32>} : memref<128x128xf32, #tpu.memory_space<vmem>>, vector<128x128xf32>,
    %c0_i32_8 = arith.constant 0 : i32
    %9 = arith.cmpi eq, %arg1, %c0_i32_8 : i32
    %10 = arith.extui %9 : i1 to i32
    %c0_i32_9 = arith.constant 0 : i32
    %11 = arith.cmpi ne, %10, %c0_i32_9 : i32
    scf.if %11 {
      %c0_10 = arith.constant 0 : index
      %c0_11 = arith.constant 0 : index
      %12 = vector.load %arg6[%c0_10, %c0_11] : memref<128x128xf32, #tpu.memory_space<vmem>>, vector<128x128xf32>
      %c0_12 = arith.constant 0 : index
      %c0_13 = arith.constant 0 : index
      %13 = vector.load %arg4[%c0_12, %c0_13] : memref<1x128xf32, #tpu.memory_space<vmem>>, vector<1x128xf32>
      %14 = vector.broadcast %13 : vector<1x128xf32> to vector<128x128xf32>
      %15 = arith.addf %12, %14 : vector<128x128xf32>
      %c0_14 = arith.constant 0 : index
      %c0_15 = arith.constant 0 : index
      %16 = vector.load %arg5[%c0_14, %c0_15] : memref<128x128xf32, #tpu.memory_space<vmem>>, vector<128x128xf32>
      tpu.vector_store %arg5[%c0_14, %c0_15], %15 {strides = array<i32>} : memref<128x128xf32, #tpu.memory_space<vmem>>, vector<128x128xf32>,
    } else {
    }
    return
  }
  func.func @transform_0(%arg0: i32, %arg1: i32) -> (i32, i32) {
    %c0_i32 = arith.constant 0 : i32
    return %arg0, %arg1 : i32, i32
  }
  func.func @transform_1(%arg0: i32, %arg1: i32) -> (i32, i32) {
    %c0_i32 = arith.constant 0 : i32
    %c0_i32_0 = arith.constant 0 : i32
    return %arg1, %c0_i32 : i32, i32
  }
  func.func @transform_2(%arg0: i32, %arg1: i32) -> (i32, i32) {
    %c0_i32 = arith.constant 0 : i32
    %c0_i32_0 = arith.constant 0 : i32
    %c0_i32_1 = arith.constant 0 : i32
    return %c0_i32, %c0_i32_0 : i32, i32
  }
  func.func @transform_3(%arg0: i32, %arg1: i32) -> (i32, i32) {
    %c0_i32 = arith.constant 0 : i32
    %c0_i32_0 = arith.constant 0 : i32
    return %arg0, %c0_i32 : i32, i32
  }
}

</mosaic_0001>

<bundles_post_ra>
// kernel: gcn_forward.5
= control target key start
LH: loop header
LB: loop body
LE: loop exit
PB: predicated region body
PF: predicated region fallthrough
CT: control target
= control target key end

     0   :  { %s618_s1 = inlined_call_operand.vmem [shape: bf16[128,128], index: 1, kind: input, shape index: {}]   ;;  %s619_s0 = inlined_call_operand.vmem [shape: bf16[128,128], index: 0, kind: input, shape index: {}]   ;;  %s620_s2 = inlined_call_operand.vmem [shape: f32[1,128], index: 2, kind: input, shape index: {}]   ;;  %s621_s3 = inlined_call_operand.vmem [shape: bf16[128,128], index: 3, kind: output, shape index: {}]  }
   0x1   :  { %v507_v0 = vld [vmem:[%s618_s1 + $0x38] sm:$0xff]   ;;  %v508_v1 = vld [vmem:[%s618_s1 + $0x30] sm:$0xff]   ;;  %v509_v2 = vld [vmem:[%s618_s1 + $0x28] sm:$0xff]  }
   0x2   :  { %459 = vmatprep.subr.bf16.mxu0 %v507_v0  ;;  %491 = vmatprep.subr.bf16.mxu1 %v507_v0  ;;  %v510_v3 = vld [vmem:[%s618_s1 + $0x20] sm:$0xff]   ;;  %v511_v6 = vld [vmem:[%s618_s1 + $0x18] sm:$0xff]   ;;  %v512_v7 = vld [vmem:[%s618_s1 + $0x10] sm:$0xff]  }
   0x3   :  { %460 = vmatpush3.bf16.msra.mxu0 %v507_v0  ;;  %499 = vmatpush3.bf16.msra.mxu1 %v507_v0  ;;  %v515_v4 = vld [vmem:[%s619_s0] sm:$0xff]   ;;  %v513_v8 = vld [vmem:[%s618_s1 + $0x8] sm:$0xff]   ;;  %v519_v12 = vld [vmem:[%s619_s0 + $0x10] sm:$0xff]  }
   0x4   :  { %461 = vmatprep.subr.bf16.mxu0 %v508_v1  ;;  %492 = vmatprep.subr.bf16.mxu1 %v508_v1  ;;  %v516_v5 = vld [vmem:[%s619_s0 + $0x20] sm:$0xff]   ;;  %v517_v10 = vld [vmem:[%s619_s0 + $0x8] sm:$0xff]   ;;  %v520_v13 = vld [vmem:[%s619_s0 + $0x30] sm:$0xff]  }
   0x5   :  { %475 = vmatprep.mubr.bf16.mxu0 %v515_v4  ;;  %483 = vmatprep.mubr.bf16.mxu1 %v516_v5  ;;  %v514_v9 = vld [vmem:[%s618_s1] sm:$0xff]   ;;  %v518_v11 = vld [vmem:[%s619_s0 + $0x28] sm:$0xff]   ;;  %v521_v14 = vld [vmem:[%s619_s0 + $0x18] sm:$0xff]  }
   0x6   :  { %v522_v15 = vld [vmem:[%s619_s0 + $0x38] sm:$0xff]   ;;  %v347_v16 = vld [vmem:[%s620_s2] ss:$0 sm:$0xff] }
   0x7   :  { %462 = vmatpush3.bf16.msra.mxu0 %v508_v1  ;;  %500 = vmatpush3.bf16.msra.mxu1 %v508_v1 }
   0x8   :  { %463 = vmatprep.subr.bf16.mxu0 %v509_v2  ;;  %493 = vmatprep.subr.bf16.mxu1 %v509_v2 }
   0xb   :  { %464 = vmatpush3.bf16.msra.mxu0 %v509_v2  ;;  %501 = vmatpush3.bf16.msra.mxu1 %v509_v2 }
   0xc   :  { %465 = vmatprep.subr.bf16.mxu0 %v510_v3  ;;  %494 = vmatprep.subr.bf16.mxu1 %v510_v3 }
   0xf   :  { %466 = vmatpush3.bf16.msra.mxu0 %v510_v3  ;;  %502 = vmatpush3.bf16.msra.mxu1 %v510_v3 }
  0x10   :  { %467 = vmatprep.subr.bf16.mxu0 %v511_v6  ;;  %495 = vmatprep.subr.bf16.mxu1 %v511_v6 }
  0x13   :  { %468 = vmatpush3.bf16.msra.mxu0 %v511_v6  ;;  %503 = vmatpush3.bf16.msra.mxu1 %v511_v6 }
  0x14   :  { %469 = vmatprep.subr.bf16.mxu0 %v512_v7  ;;  %496 = vmatprep.subr.bf16.mxu1 %v512_v7 }
  0x17   :  { %470 = vmatpush3.bf16.msra.mxu0 %v512_v7  ;;  %504 = vmatpush3.bf16.msra.mxu1 %v512_v7 }
  0x18   :  { %471 = vmatprep.subr.bf16.mxu0 %v513_v8  ;;  %497 = vmatprep.subr.bf16.mxu1 %v513_v8 }
  0x1b   :  { %472 = vmatpush3.bf16.msra.mxu0 %v513_v8  ;;  %505 = vmatpush3.bf16.msra.mxu1 %v513_v8 }
  0x1c   :  { %473 = vmatprep.subr.bf16.mxu0 %v514_v9  ;;  %498 = vmatprep.subr.bf16.mxu1 %v514_v9 }
  0x1f   :  { %474 = vmatpush3.bf16.msra.mxu0 %v514_v9  ;;  %506 = vmatpush3.bf16.msra.mxu1 %v514_v9 }
  0x22   :  { %476 = vmatmul.mubr.bf16.vlgmr.msra.gmra.mxu0 %v517_v10  ;;  %484 = vmatmul.mubr.bf16.vlgmr.msra.gmra.mxu1 %v518_v11 }
  0x23   :  { %479 = vmatprep.mubr.bf16.mxu0 %v519_v12  ;;  %487 = vmatprep.mubr.bf16.mxu1 %v520_v13 }
  0x2a   :  { %480 = vmatmul.mubr.bf16.gmra.mxu0 %v521_v14  ;;  %488 = vmatmul.mubr.bf16.gmra.mxu1 %v522_v15 }
  0xe2   :  { %v477_v17 = vpop.f32.mrf.mxu0  ;;  %v485_v18 = vpop.f32.mrf.mxu1 }
  0xe3   :  { %v193_v19 = vadd.f32 %v477_v17, %v347_v16  ;;  %v225_v20 = vadd.f32 %v485_v18, %v347_v16 }
  0xe4   :  { %v184_v21 = vpop.f32.mrf.mxu0  ;;  %v216_v22 = vpop.f32.mrf.mxu1 }
  0xe5   :  { %v185_v23 = vadd.f32 %v347_v16, %v184_v21  ;;  %v217_v24 = vadd.f32 %v347_v16, %v216_v22  ;;  %v249_v29 = vmax.f32 %v193_v19, 0.0  ;;  %v257_v30 = vmax.f32 %v225_v20, 0.0 }
  0xe6   :  { %v478_v25 = vpop.f32.mrf.mxu0  ;;  %v486_v26 = vpop.f32.mrf.mxu1 }
  0xe7   :  { %v196_v27 = vadd.f32 %v478_v25, %v347_v16  ;;  %v228_v28 = vadd.f32 %v486_v26, %v347_v16  ;;  %v247_v37 = vmax.f32 %v185_v23, 0.0  ;;  %v255_v38 = vmax.f32 %v217_v24, 0.0 }
  0xe8   :  { %v187_v31 = vpop.f32.mrf.mxu0  ;;  %v219_v32 = vpop.f32.mrf.mxu1 }
  0xe9   :  { %v250_v33 = vmax.f32 %v196_v27, 0.0  ;;  %v258_v34 = vmax.f32 %v228_v28, 0.0  ;;  %v188_v35 = vadd.f32 %v347_v16, %v187_v31  ;;  %v220_v36 = vadd.f32 %v347_v16, %v219_v32 }
  0xea   :  { %v481_v39 = vpop.f32.mrf.mxu0  ;;  %v489_v40 = vpop.f32.mrf.mxu1 }
  0xeb   :  { %v404_v41 = vpack.c.bf16 %v250_v33, %v249_v29  ;;  %v424_v42 = vpack.c.bf16 %v258_v34, %v257_v30  ;;  %v248_v43 = vmax.f32 %v188_v35, 0.0  ;;  %v256_v44 = vmax.f32 %v220_v36, 0.0 }
  0xec   :  { %v209_v45 = vadd.f32 %v481_v39, %v347_v16  ;;  %v241_v46 = vadd.f32 %v489_v40, %v347_v16  ;;  %v200_v47 = vpop.f32.mrf.mxu0  ;;  %v232_v48 = vpop.f32.mrf.mxu1 }
  0xed   :  { %436 = vst [vmem:[%s621_s3 + $0x8] sm:$0xff] %v404_v41   ;;  %440 = vst [vmem:[%s621_s3 + $0x28] sm:$0xff] %v424_v42   ;;  %v399_v49 = vpack.c.bf16 %v248_v43, %v247_v37  ;;  %v419_v50 = vpack.c.bf16 %v256_v44, %v255_v38  ;;  %v201_v51 = vadd.f32 %v347_v16, %v200_v47 }
  0xee   :  { %v233_v52 = vadd.f32 %v347_v16, %v232_v48  ;;  %v482_v53 = vpop.f32.mrf.mxu0  ;;  %v490_v54 = vpop.f32.mrf.mxu1  ;;  %v253_v57 = vmax.f32 %v209_v45, 0.0  ;;  %v261_v58 = vmax.f32 %v241_v46, 0.0 }
  0xef   :  { %400 = vst [vmem:[%s621_s3] sm:$0xff] %v399_v49   ;;  %439 = vst [vmem:[%s621_s3 + $0x20] sm:$0xff] %v419_v50   ;;  %v212_v55 = vadd.f32 %v482_v53, %v347_v16  ;;  %v244_v56 = vadd.f32 %v490_v54, %v347_v16  ;;  %v251_v1 = vmax.f32 %v201_v51, 0.0 }
  0xf0   :  { %v203_v59 = vpop.f32.mrf.mxu0  ;;  %v235_v60 = vpop.f32.mrf.mxu1  ;;  %v259_v2 = vmax.f32 %v233_v52, 0.0 }
  0xf1   :  { %v254_v61 = vmax.f32 %v212_v55, 0.0  ;;  %v262_v62 = vmax.f32 %v244_v56, 0.0  ;;  %v204_v63 = vadd.f32 %v347_v16, %v203_v59  ;;  %v236_v0 = vadd.f32 %v347_v16, %v235_v60 }
  0xf3   :  { %v414_v3 = vpack.c.bf16 %v254_v61, %v253_v57  ;;  %v434_v4 = vpack.c.bf16 %v262_v62, %v261_v58  ;;  %v252_v5 = vmax.f32 %v204_v63, 0.0  ;;  %v260_v6 = vmax.f32 %v236_v0, 0.0 }
  0xf5   :  { %438 = vst [vmem:[%s621_s3 + $0x18] sm:$0xff] %v414_v3   ;;  %442 = vst [vmem:[%s621_s3 + $0x38] sm:$0xff] %v434_v4   ;;  %v409_v7 = vpack.c.bf16 %v252_v5, %v251_v1  ;;  %v429_v8 = vpack.c.bf16 %v260_v6, %v259_v2 }
  0xf7   :  { %437 = vst [vmem:[%s621_s3 + $0x10] sm:$0xff] %v409_v7   ;;  %441 = vst [vmem:[%s621_s3 + $0x30] sm:$0xff] %v429_v8  }

// kernel: gcn_forward.4
= control target key start
LH: loop header
LB: loop body
LE: loop exit
PB: predicated region body
PF: predicated region fallthrough
CT: control target
= control target key end

     0   :  { %s705_s1 = inlined_call_operand.vmem [shape: bf16[128,128], index: 1, kind: input, shape index: {}]   ;;  %s706_s0 = inlined_call_operand.vmem [shape: bf16[128,128], index: 0, kind: input, shape index: {}]   ;;  %s707_s2 = inlined_call_operand.vmem [shape: f32[1,128], index: 2, kind: input, shape index: {}]   ;;  %s708_s3 = inlined_call_operand.vmem [shape: bf16[128,128], index: 3, kind: output, shape index: {}]  }
   0x1   :  { %v594_v0 = vld [vmem:[%s705_s1 + $0x38] sm:$0xff]   ;;  %v595_v1 = vld [vmem:[%s705_s1 + $0x30] sm:$0xff]   ;;  %v596_v2 = vld [vmem:[%s705_s1 + $0x28] sm:$0xff]  }
   0x2   :  { %546 = vmatprep.subr.bf16.mxu0 %v594_v0  ;;  %578 = vmatprep.subr.bf16.mxu1 %v594_v0  ;;  %v597_v3 = vld [vmem:[%s705_s1 + $0x20] sm:$0xff]   ;;  %v598_v6 = vld [vmem:[%s705_s1 + $0x18] sm:$0xff]   ;;  %v599_v7 = vld [vmem:[%s705_s1 + $0x10] sm:$0xff]  }
   0x3   :  { %547 = vmatpush3.bf16.msra.mxu0 %v594_v0  ;;  %586 = vmatpush3.bf16.msra.mxu1 %v594_v0  ;;  %v602_v4 = vld [vmem:[%s706_s0] sm:$0xff]   ;;  %v600_v8 = vld [vmem:[%s705_s1 + $0x8] sm:$0xff]   ;;  %v606_v12 = vld [vmem:[%s706_s0 + $0x10] sm:$0xff]  }
   0x4   :  { %548 = vmatprep.subr.bf16.mxu0 %v595_v1  ;;  %579 = vmatprep.subr.bf16.mxu1 %v595_v1  ;;  %v603_v5 = vld [vmem:[%s706_s0 + $0x20] sm:$0xff]   ;;  %v604_v10 = vld [vmem:[%s706_s0 + $0x8] sm:$0xff]   ;;  %v607_v13 = vld [vmem:[%s706_s0 + $0x30] sm:$0xff]  }
   0x5   :  { %562 = vmatprep.mubr.bf16.mxu0 %v602_v4  ;;  %570 = vmatprep.mubr.bf16.mxu1 %v603_v5  ;;  %v601_v9 = vld [vmem:[%s705_s1] sm:$0xff]   ;;  %v605_v11 = vld [vmem:[%s706_s0 + $0x28] sm:$0xff]   ;;  %v608_v14 = vld [vmem:[%s706_s0 + $0x18] sm:$0xff]  }
   0x6   :  { %v609_v15 = vld [vmem:[%s706_s0 + $0x38] sm:$0xff]   ;;  %v450_v18 = vld [vmem:[%s707_s2] ss:$0 sm:$0xff] }
   0x7   :  { %549 = vmatpush3.bf16.msra.mxu0 %v595_v1  ;;  %587 = vmatpush3.bf16.msra.mxu1 %v595_v1 }
   0x8   :  { %550 = vmatprep.subr.bf16.mxu0 %v596_v2  ;;  %580 = vmatprep.subr.bf16.mxu1 %v596_v2 }
   0xb   :  { %551 = vmatpush3.bf16.msra.mxu0 %v596_v2  ;;  %588 = vmatpush3.bf16.msra.mxu1 %v596_v2 }
   0xc   :  { %552 = vmatprep.subr.bf16.mxu0 %v597_v3  ;;  %581 = vmatprep.subr.bf16.mxu1 %v597_v3 }
   0xf   :  { %553 = vmatpush3.bf16.msra.mxu0 %v597_v3  ;;  %589 = vmatpush3.bf16.msra.mxu1 %v597_v3 }
  0x10   :  { %554 = vmatprep.subr.bf16.mxu0 %v598_v6  ;;  %582 = vmatprep.subr.bf16.mxu1 %v598_v6 }
  0x13   :  { %555 = vmatpush3.bf16.msra.mxu0 %v598_v6  ;;  %590 = vmatpush3.bf16.msra.mxu1 %v598_v6 }
  0x14   :  { %556 = vmatprep.subr.bf16.mxu0 %v599_v7  ;;  %583 = vmatprep.subr.bf16.mxu1 %v599_v7 }
  0x17   :  { %557 = vmatpush3.bf16.msra.mxu0 %v599_v7  ;;  %591 = vmatpush3.bf16.msra.mxu1 %v599_v7 }
  0x18   :  { %558 = vmatprep.subr.bf16.mxu0 %v600_v8  ;;  %584 = vmatprep.subr.bf16.mxu1 %v600_v8 }
  0x1b   :  { %559 = vmatpush3.bf16.msra.mxu0 %v600_v8  ;;  %592 = vmatpush3.bf16.msra.mxu1 %v600_v8 }
  0x1c   :  { %560 = vmatprep.subr.bf16.mxu0 %v601_v9  ;;  %585 = vmatprep.subr.bf16.mxu1 %v601_v9 }
  0x1f   :  { %561 = vmatpush3.bf16.msra.mxu0 %v601_v9  ;;  %593 = vmatpush3.bf16.msra.mxu1 %v601_v9 }
  0x22   :  { %563 = vmatmul.mubr.bf16.vlgmr.msra.gmra.mxu0 %v604_v10  ;;  %571 = vmatmul.mubr.bf16.vlgmr.msra.gmra.mxu1 %v605_v11 }
  0x23   :  { %566 = vmatprep.mubr.bf16.mxu0 %v606_v12  ;;  %574 = vmatprep.mubr.bf16.mxu1 %v607_v13 }
  0x2a   :  { %567 = vmatmul.mubr.bf16.gmra.mxu0 %v608_v14  ;;  %575 = vmatmul.mubr.bf16.gmra.mxu1 %v609_v15 }
  0xe2   :  { %v564_v16 = vpop.f32.mrf.mxu0  ;;  %v572_v17 = vpop.f32.mrf.mxu1 }
  0xe3   :  { %v336_v23 = vadd.f32 %v564_v16, %v450_v18  ;;  %v344_v24 = vadd.f32 %v572_v17, %v450_v18 }
  0xe4   :  { %v213_v19 = vpop.f32.mrf.mxu0  ;;  %v245_v20 = vpop.f32.mrf.mxu1 }
  0xe5   :  { %v334_v27 = vadd.f32 %v450_v18, %v213_v19  ;;  %v342_v28 = vadd.f32 %v450_v18, %v245_v20 }
  0xe6   :  { %v565_v21 = vpop.f32.mrf.mxu0  ;;  %v573_v22 = vpop.f32.mrf.mxu1 }
  0xe7   :  { %v337_v25 = vadd.f32 %v565_v21, %v450_v18  ;;  %v345_v26 = vadd.f32 %v573_v22, %v450_v18 }
  0xe8   :  { %v216_v29 = vpop.f32.mrf.mxu0  ;;  %v248_v30 = vpop.f32.mrf.mxu1 }
  0xe9   :  { %v491_v31 = vpack.c.bf16 %v337_v25, %v336_v23  ;;  %v511_v32 = vpack.c.bf16 %v345_v26, %v344_v24  ;;  %v335_v33 = vadd.f32 %v450_v18, %v216_v29  ;;  %v343_v34 = vadd.f32 %v450_v18, %v248_v30 }
  0xea   :  { %v568_v35 = vpop.f32.mrf.mxu0  ;;  %v576_v36 = vpop.f32.mrf.mxu1 }
  0xeb   :  { %523 = vst [vmem:[%s708_s3 + $0x8] sm:$0xff] %v491_v31   ;;  %527 = vst [vmem:[%s708_s3 + $0x28] sm:$0xff] %v511_v32   ;;  %v486_v37 = vpack.c.bf16 %v335_v33, %v334_v27  ;;  %v506_v38 = vpack.c.bf16 %v343_v34, %v342_v28  ;;  %v340_v43 = vadd.f32 %v568_v35, %v450_v18 }
  0xec   :  { %v229_v39 = vpop.f32.mrf.mxu0  ;;  %v261_v40 = vpop.f32.mrf.mxu1  ;;  %v348_v44 = vadd.f32 %v576_v36, %v450_v18 }
  0xed   :  { %487 = vst [vmem:[%s708_s3] sm:$0xff] %v486_v37   ;;  %526 = vst [vmem:[%s708_s3 + $0x20] sm:$0xff] %v506_v38   ;;  %v338_v47 = vadd.f32 %v450_v18, %v229_v39  ;;  %v346_v48 = vadd.f32 %v450_v18, %v261_v40 }
  0xee   :  { %v569_v41 = vpop.f32.mrf.mxu0  ;;  %v577_v42 = vpop.f32.mrf.mxu1 }
  0xef   :  { %v341_v45 = vadd.f32 %v569_v41, %v450_v18  ;;  %v349_v46 = vadd.f32 %v577_v42, %v450_v18 }
  0xf0   :  { %v232_v49 = vpop.f32.mrf.mxu0  ;;  %v264_v50 = vpop.f32.mrf.mxu1 }
  0xf1   :  { %v501_v51 = vpack.c.bf16 %v341_v45, %v340_v43  ;;  %v521_v52 = vpack.c.bf16 %v349_v46, %v348_v44  ;;  %v339_v53 = vadd.f32 %v450_v18, %v232_v49  ;;  %v347_v54 = vadd.f32 %v450_v18, %v264_v50 }
  0xf3   :  { %525 = vst [vmem:[%s708_s3 + $0x18] sm:$0xff] %v501_v51   ;;  %529 = vst [vmem:[%s708_s3 + $0x38] sm:$0xff] %v521_v52   ;;  %v496_v55 = vpack.c.bf16 %v339_v53, %v338_v47  ;;  %v516_v56 = vpack.c.bf16 %v347_v54, %v346_v48 }
  0xf5   :  { %524 = vst [vmem:[%s708_s3 + $0x10] sm:$0xff] %v496_v55   ;;  %528 = vst [vmem:[%s708_s3 + $0x30] sm:$0xff] %v516_v56  }

// kernel: gcn_forward.6
= control target key start
LH: loop header
LB: loop body
LE: loop exit
PB: predicated region body
PF: predicated region fallthrough
CT: control target
= control target key end

     0   :  { %s602_s1 = inlined_call_operand.vmem [shape: bf16[128,128], index: 1, kind: input, shape index: {}]   ;;  %s603_s0 = inlined_call_operand.vmem [shape: bf16[128,128], index: 0, kind: input, shape index: {}]   ;;  %s604_s2 = inlined_call_operand.vmem [shape: f32[1,128], index: 2, kind: input, shape index: {}]   ;;  %s605_s3 = inlined_call_operand.vmem [shape: bf16[128,128], index: 3, kind: output, shape index: {}]  }
   0x1   :  { %v491_v0 = vld [vmem:[%s602_s1 + $0x38] sm:$0xff]   ;;  %v492_v1 = vld [vmem:[%s602_s1 + $0x30] sm:$0xff]   ;;  %v493_v2 = vld [vmem:[%s602_s1 + $0x28] sm:$0xff]  }
   0x2   :  { %443 = vmatprep.subr.bf16.mxu0 %v491_v0  ;;  %475 = vmatprep.subr.bf16.mxu1 %v491_v0  ;;  %v494_v3 = vld [vmem:[%s602_s1 + $0x20] sm:$0xff]   ;;  %v495_v6 = vld [vmem:[%s602_s1 + $0x18] sm:$0xff]   ;;  %v496_v7 = vld [vmem:[%s602_s1 + $0x10] sm:$0xff]  }
   0x3   :  { %444 = vmatpush3.bf16.msra.mxu0 %v491_v0  ;;  %483 = vmatpush3.bf16.msra.mxu1 %v491_v0  ;;  %v499_v4 = vld [vmem:[%s603_s0] sm:$0xff]   ;;  %v497_v8 = vld [vmem:[%s602_s1 + $0x8] sm:$0xff]   ;;  %v503_v12 = vld [vmem:[%s603_s0 + $0x10] sm:$0xff]  }
   0x4   :  { %445 = vmatprep.subr.bf16.mxu0 %v492_v1  ;;  %476 = vmatprep.subr.bf16.mxu1 %v492_v1  ;;  %v500_v5 = vld [vmem:[%s603_s0 + $0x20] sm:$0xff]   ;;  %v501_v10 = vld [vmem:[%s603_s0 + $0x8] sm:$0xff]   ;;  %v504_v13 = vld [vmem:[%s603_s0 + $0x30] sm:$0xff]  }
   0x5   :  { %459 = vmatprep.mubr.bf16.mxu0 %v499_v4  ;;  %467 = vmatprep.mubr.bf16.mxu1 %v500_v5  ;;  %v498_v9 = vld [vmem:[%s602_s1] sm:$0xff]   ;;  %v502_v11 = vld [vmem:[%s603_s0 + $0x28] sm:$0xff]   ;;  %v505_v14 = vld [vmem:[%s603_s0 + $0x18] sm:$0xff]  }
   0x6   :  { %v506_v15 = vld [vmem:[%s603_s0 + $0x38] sm:$0xff]   ;;  %v331_v18 = vld [vmem:[%s604_s2] ss:$0 sm:$0xff] }
   0x7   :  { %446 = vmatpush3.bf16.msra.mxu0 %v492_v1  ;;  %484 = vmatpush3.bf16.msra.mxu1 %v492_v1 }
   0x8   :  { %447 = vmatprep.subr.bf16.mxu0 %v493_v2  ;;  %477 = vmatprep.subr.bf16.mxu1 %v493_v2 }
   0xb   :  { %448 = vmatpush3.bf16.msra.mxu0 %v493_v2  ;;  %485 = vmatpush3.bf16.msra.mxu1 %v493_v2 }
   0xc   :  { %449 = vmatprep.subr.bf16.mxu0 %v494_v3  ;;  %478 = vmatprep.subr.bf16.mxu1 %v494_v3 }
   0xf   :  { %450 = vmatpush3.bf16.msra.mxu0 %v494_v3  ;;  %486 = vmatpush3.bf16.msra.mxu1 %v494_v3 }
  0x10   :  { %451 = vmatprep.subr.bf16.mxu0 %v495_v6  ;;  %479 = vmatprep.subr.bf16.mxu1 %v495_v6 }
  0x13   :  { %452 = vmatpush3.bf16.msra.mxu0 %v495_v6  ;;  %487 = vmatpush3.bf16.msra.mxu1 %v495_v6 }
  0x14   :  { %453 = vmatprep.subr.bf16.mxu0 %v496_v7  ;;  %480 = vmatprep.subr.bf16.mxu1 %v496_v7 }
  0x17   :  { %454 = vmatpush3.bf16.msra.mxu0 %v496_v7  ;;  %488 = vmatpush3.bf16.msra.mxu1 %v496_v7 }
  0x18   :  { %455 = vmatprep.subr.bf16.mxu0 %v497_v8  ;;  %481 = vmatprep.subr.bf16.mxu1 %v497_v8 }
  0x1b   :  { %456 = vmatpush3.bf16.msra.mxu0 %v497_v8  ;;  %489 = vmatpush3.bf16.msra.mxu1 %v497_v8 }
  0x1c   :  { %457 = vmatprep.subr.bf16.mxu0 %v498_v9  ;;  %482 = vmatprep.subr.bf16.mxu1 %v498_v9 }
  0x1f   :  { %458 = vmatpush3.bf16.msra.mxu0 %v498_v9  ;;  %490 = vmatpush3.bf16.msra.mxu1 %v498_v9 }
  0x22   :  { %460 = vmatmul.mubr.bf16.vlgmr.msra.gmra.mxu0 %v501_v10  ;;  %468 = vmatmul.mubr.bf16.vlgmr.msra.gmra.mxu1 %v502_v11 }
  0x23   :  { %463 = vmatprep.mubr.bf16.mxu0 %v503_v12  ;;  %471 = vmatprep.mubr.bf16.mxu1 %v504_v13 }
  0x2a   :  { %464 = vmatmul.mubr.bf16.gmra.mxu0 %v505_v14  ;;  %472 = vmatmul.mubr.bf16.gmra.mxu1 %v506_v15 }
  0xe2   :  { %v461_v16 = vpop.f32.mrf.mxu0  ;;  %v469_v17 = vpop.f32.mrf.mxu1 }
  0xe3   :  { %v193_v23 = vadd.f32 %v461_v16, %v331_v18  ;;  %v225_v24 = vadd.f32 %v469_v17, %v331_v18 }
  0xe4   :  { %v184_v19 = vpop.f32.mrf.mxu0  ;;  %v216_v20 = vpop.f32.mrf.mxu1 }
  0xe5   :  { %v185_v27 = vadd.f32 %v331_v18, %v184_v19  ;;  %v217_v28 = vadd.f32 %v331_v18, %v216_v20 }
  0xe6   :  { %v462_v21 = vpop.f32.mrf.mxu0  ;;  %v470_v22 = vpop.f32.mrf.mxu1 }
  0xe7   :  { %v196_v25 = vadd.f32 %v462_v21, %v331_v18  ;;  %v228_v26 = vadd.f32 %v470_v22, %v331_v18 }
  0xe8   :  { %v187_v29 = vpop.f32.mrf.mxu0  ;;  %v219_v30 = vpop.f32.mrf.mxu1 }
  0xe9   :  { %v388_v31 = vpack.c.bf16 %v196_v25, %v193_v23  ;;  %v408_v32 = vpack.c.bf16 %v228_v26, %v225_v24  ;;  %v188_v33 = vadd.f32 %v331_v18, %v187_v29  ;;  %v220_v34 = vadd.f32 %v331_v18, %v219_v30 }
  0xea   :  { %v465_v35 = vpop.f32.mrf.mxu0  ;;  %v473_v36 = vpop.f32.mrf.mxu1 }
  0xeb   :  { %420 = vst [vmem:[%s605_s3 + $0x8] sm:$0xff] %v388_v31   ;;  %424 = vst [vmem:[%s605_s3 + $0x28] sm:$0xff] %v408_v32   ;;  %v383_v37 = vpack.c.bf16 %v188_v33, %v185_v27  ;;  %v403_v38 = vpack.c.bf16 %v220_v34, %v217_v28  ;;  %v209_v43 = vadd.f32 %v465_v35, %v331_v18 }
  0xec   :  { %v200_v39 = vpop.f32.mrf.mxu0  ;;  %v232_v40 = vpop.f32.mrf.mxu1  ;;  %v241_v44 = vadd.f32 %v473_v36, %v331_v18 }
  0xed   :  { %384 = vst [vmem:[%s605_s3] sm:$0xff] %v383_v37   ;;  %423 = vst [vmem:[%s605_s3 + $0x20] sm:$0xff] %v403_v38   ;;  %v201_v47 = vadd.f32 %v331_v18, %v200_v39  ;;  %v233_v48 = vadd.f32 %v331_v18, %v232_v40 }
  0xee   :  { %v466_v41 = vpop.f32.mrf.mxu0  ;;  %v474_v42 = vpop.f32.mrf.mxu1 }
  0xef   :  { %v212_v45 = vadd.f32 %v466_v41, %v331_v18  ;;  %v244_v46 = vadd.f32 %v474_v42, %v331_v18 }
  0xf0   :  { %v203_v49 = vpop.f32.mrf.mxu0  ;;  %v235_v50 = vpop.f32.mrf.mxu1 }
  0xf1   :  { %v398_v51 = vpack.c.bf16 %v212_v45, %v209_v43  ;;  %v418_v52 = vpack.c.bf16 %v244_v46, %v241_v44  ;;  %v204_v53 = vadd.f32 %v331_v18, %v203_v49  ;;  %v236_v54 = vadd.f32 %v331_v18, %v235_v50 }
  0xf3   :  { %422 = vst [vmem:[%s605_s3 + $0x18] sm:$0xff] %v398_v51   ;;  %426 = vst [vmem:[%s605_s3 + $0x38] sm:$0xff] %v418_v52   ;;  %v393_v55 = vpack.c.bf16 %v204_v53, %v201_v47  ;;  %v413_v56 = vpack.c.bf16 %v236_v54, %v233_v48 }
  0xf5   :  { %421 = vst [vmem:[%s605_s3 + $0x10] sm:$0xff] %v393_v55   ;;  %425 = vst [vmem:[%s605_s3 + $0x30] sm:$0xff] %v413_v56  }

// kernel: gcn_forward.7
= control target key start
LH: loop header
LB: loop body
LE: loop exit
PB: predicated region body
PF: predicated region fallthrough
CT: control target
= control target key end

     0   :  { %s586_s1 = inlined_call_operand.vmem [shape: bf16[128,128], index: 1, kind: input, shape index: {}]   ;;  %s587_s0 = inlined_call_operand.vmem [shape: bf16[128,128], index: 0, kind: input, shape index: {}]   ;;  %s588_s2 = inlined_call_operand.vmem [shape: f32[1,128], index: 2, kind: input, shape index: {}]   ;;  %s589_s3 = inlined_call_operand.vmem [shape: f32[128,128], index: 3, kind: output, shape index: {}]  }
   0x1   :  { %v451_v0 = vld [vmem:[%s586_s1 + $0x38] sm:$0xff]   ;;  %v452_v1 = vld [vmem:[%s586_s1 + $0x30] sm:$0xff]   ;;  %v453_v2 = vld [vmem:[%s586_s1 + $0x28] sm:$0xff]  }
   0x2   :  { %403 = vmatprep.subr.bf16.mxu0 %v451_v0  ;;  %435 = vmatprep.subr.bf16.mxu1 %v451_v0  ;;  %v454_v3 = vld [vmem:[%s586_s1 + $0x20] sm:$0xff]   ;;  %v455_v6 = vld [vmem:[%s586_s1 + $0x18] sm:$0xff]   ;;  %v456_v7 = vld [vmem:[%s586_s1 + $0x10] sm:$0xff]  }
   0x3   :  { %404 = vmatpush3.bf16.msra.mxu0 %v451_v0  ;;  %443 = vmatpush3.bf16.msra.mxu1 %v451_v0  ;;  %v459_v4 = vld [vmem:[%s587_s0] sm:$0xff]   ;;  %v457_v8 = vld [vmem:[%s586_s1 + $0x8] sm:$0xff]   ;;  %v463_v12 = vld [vmem:[%s587_s0 + $0x10] sm:$0xff]  }
   0x4   :  { %405 = vmatprep.subr.bf16.mxu0 %v452_v1  ;;  %436 = vmatprep.subr.bf16.mxu1 %v452_v1  ;;  %v460_v5 = vld [vmem:[%s587_s0 + $0x20] sm:$0xff]   ;;  %v461_v10 = vld [vmem:[%s587_s0 + $0x8] sm:$0xff]   ;;  %v464_v13 = vld [vmem:[%s587_s0 + $0x30] sm:$0xff]  }
   0x5   :  { %419 = vmatprep.mubr.bf16.mxu0 %v459_v4  ;;  %427 = vmatprep.mubr.bf16.mxu1 %v460_v5  ;;  %v458_v9 = vld [vmem:[%s586_s1] sm:$0xff]   ;;  %v462_v11 = vld [vmem:[%s587_s0 + $0x28] sm:$0xff]   ;;  %v465_v14 = vld [vmem:[%s587_s0 + $0x18] sm:$0xff]  }
   0x6   :  { %v466_v15 = vld [vmem:[%s587_s0 + $0x38] sm:$0xff]   ;;  %v386_v16 = vld [vmem:[%s588_s2] ss:$0 sm:$0xff] }
   0x7   :  { %406 = vmatpush3.bf16.msra.mxu0 %v452_v1  ;;  %444 = vmatpush3.bf16.msra.mxu1 %v452_v1 }
   0x8   :  { %407 = vmatprep.subr.bf16.mxu0 %v453_v2  ;;  %437 = vmatprep.subr.bf16.mxu1 %v453_v2 }
   0xb   :  { %408 = vmatpush3.bf16.msra.mxu0 %v453_v2  ;;  %445 = vmatpush3.bf16.msra.mxu1 %v453_v2 }
   0xc   :  { %409 = vmatprep.subr.bf16.mxu0 %v454_v3  ;;  %438 = vmatprep.subr.bf16.mxu1 %v454_v3 }
   0xf   :  { %410 = vmatpush3.bf16.msra.mxu0 %v454_v3  ;;  %446 = vmatpush3.bf16.msra.mxu1 %v454_v3 }
  0x10   :  { %411 = vmatprep.subr.bf16.mxu0 %v455_v6  ;;  %439 = vmatprep.subr.bf16.mxu1 %v455_v6 }
  0x13   :  { %412 = vmatpush3.bf16.msra.mxu0 %v455_v6  ;;  %447 = vmatpush3.bf16.msra.mxu1 %v455_v6 }
  0x14   :  { %413 = vmatprep.subr.bf16.mxu0 %v456_v7  ;;  %440 = vmatprep.subr.bf16.mxu1 %v456_v7 }
  0x17   :  { %414 = vmatpush3.bf16.msra.mxu0 %v456_v7  ;;  %448 = vmatpush3.bf16.msra.mxu1 %v456_v7 }
  0x18   :  { %415 = vmatprep.subr.bf16.mxu0 %v457_v8  ;;  %441 = vmatprep.subr.bf16.mxu1 %v457_v8 }
  0x1b   :  { %416 = vmatpush3.bf16.msra.mxu0 %v457_v8  ;;  %449 = vmatpush3.bf16.msra.mxu1 %v457_v8 }
  0x1c   :  { %417 = vmatprep.subr.bf16.mxu0 %v458_v9  ;;  %442 = vmatprep.subr.bf16.mxu1 %v458_v9 }
  0x1f   :  { %418 = vmatpush3.bf16.msra.mxu0 %v458_v9  ;;  %450 = vmatpush3.bf16.msra.mxu1 %v458_v9 }
  0x22   :  { %420 = vmatmul.mubr.bf16.vlgmr.msra.gmra.mxu0 %v461_v10  ;;  %428 = vmatmul.mubr.bf16.vlgmr.msra.gmra.mxu1 %v462_v11 }
  0x23   :  { %423 = vmatprep.mubr.bf16.mxu0 %v463_v12  ;;  %431 = vmatprep.mubr.bf16.mxu1 %v464_v13 }
  0x2a   :  { %424 = vmatmul.mubr.bf16.gmra.mxu0 %v465_v14  ;;  %432 = vmatmul.mubr.bf16.gmra.mxu1 %v466_v15 }
  0xe2   :  { %v421_v17 = vpop.f32.mrf.mxu0  ;;  %v429_v18 = vpop.f32.mrf.mxu1 }
  0xe3   :  { %v336_v19 = vadd.f32 %v421_v17, %v386_v16  ;;  %v344_v20 = vadd.f32 %v429_v18, %v386_v16 }
  0xe4   :  { %v213_v21 = vpop.f32.mrf.mxu0  ;;  %v245_v22 = vpop.f32.mrf.mxu1 }
  0xe5   :  { %352 = vst [vmem:[%s589_s3 + $0x10] sm:$0xff] %v336_v19  ;;  %360 = vst [vmem:[%s589_s3 + $0x50] sm:$0xff] %v344_v20  ;;  %v334_v23 = vadd.f32 %v386_v16, %v213_v21  ;;  %v342_v24 = vadd.f32 %v386_v16, %v245_v22 }
  0xe6   :  { %v422_v25 = vpop.f32.mrf.mxu0  ;;  %v430_v26 = vpop.f32.mrf.mxu1 }
  0xe7   :  { %350 = vst [vmem:[%s589_s3] sm:$0xff] %v334_v23  ;;  %358 = vst [vmem:[%s589_s3 + $0x40] sm:$0xff] %v342_v24  ;;  %v337_v27 = vadd.f32 %v422_v25, %v386_v16  ;;  %v345_v28 = vadd.f32 %v430_v26, %v386_v16 }
  0xe8   :  { %v216_v29 = vpop.f32.mrf.mxu0  ;;  %v248_v30 = vpop.f32.mrf.mxu1 }
  0xe9   :  { %353 = vst [vmem:[%s589_s3 + $0x18] sm:$0xff] %v337_v27  ;;  %361 = vst [vmem:[%s589_s3 + $0x58] sm:$0xff] %v345_v28  ;;  %v335_v31 = vadd.f32 %v386_v16, %v216_v29  ;;  %v343_v32 = vadd.f32 %v386_v16, %v248_v30 }
  0xea   :  { %v425_v33 = vpop.f32.mrf.mxu0  ;;  %v433_v34 = vpop.f32.mrf.mxu1 }
  0xeb   :  { %351 = vst [vmem:[%s589_s3 + $0x8] sm:$0xff] %v335_v31  ;;  %359 = vst [vmem:[%s589_s3 + $0x48] sm:$0xff] %v343_v32  ;;  %v340_v35 = vadd.f32 %v425_v33, %v386_v16  ;;  %v348_v36 = vadd.f32 %v433_v34, %v386_v16 }
  0xec   :  { %v229_v37 = vpop.f32.mrf.mxu0  ;;  %v261_v38 = vpop.f32.mrf.mxu1 }
  0xed   :  { %356 = vst [vmem:[%s589_s3 + $0x30] sm:$0xff] %v340_v35  ;;  %364 = vst [vmem:[%s589_s3 + $0x70] sm:$0xff] %v348_v36  ;;  %v338_v39 = vadd.f32 %v386_v16, %v229_v37  ;;  %v346_v40 = vadd.f32 %v386_v16, %v261_v38 }
  0xee   :  { %v426_v41 = vpop.f32.mrf.mxu0  ;;  %v434_v42 = vpop.f32.mrf.mxu1 }
  0xef   :  { %354 = vst [vmem:[%s589_s3 + $0x20] sm:$0xff] %v338_v39  ;;  %362 = vst [vmem:[%s589_s3 + $0x60] sm:$0xff] %v346_v40  ;;  %v341_v43 = vadd.f32 %v426_v41, %v386_v16  ;;  %v349_v44 = vadd.f32 %v434_v42, %v386_v16 }
  0xf0   :  { %v232_v45 = vpop.f32.mrf.mxu0  ;;  %v264_v46 = vpop.f32.mrf.mxu1 }
  0xf1   :  { %357 = vst [vmem:[%s589_s3 + $0x38] sm:$0xff] %v341_v43  ;;  %365 = vst [vmem:[%s589_s3 + $0x78] sm:$0xff] %v349_v44  ;;  %v339_v47 = vadd.f32 %v386_v16, %v232_v45  ;;  %v347_v48 = vadd.f32 %v386_v16, %v264_v46 }
  0xf3   :  { %355 = vst [vmem:[%s589_s3 + $0x28] sm:$0xff] %v339_v47  ;;  %363 = vst [vmem:[%s589_s3 + $0x68] sm:$0xff] %v347_v48 }

</bundles_post_ra>
